<compile_context>
chip_gen: v6e
topology: v6e:2x2x1
jax: 0.10.0
libtpu: 0.0.40
codegen_flags: <defaults>
</compile_context>

<pallas_src>
import math

import jax
import jax.numpy as jnp
from jax import lax
from jax.experimental import pallas as pl
from jax.experimental.pallas import tpu as pltpu

EPS = 1e-5
CONV_ROW_TILE = 256        # rows of the flattened (N*Ho*Wo) dim per conv step
ELTWISE_ROW_TILE = 1024    # rows of the lane-dense view per elementwise step
VMEM_LIMIT = 32 * 1024 * 1024


def _pick_tile(n, target, align=8):
    """Largest divisor of n that is <= target and a multiple of `align`
    (falls back to n itself, i.e. a single block)."""
    if n <= target:
        return n
    cands = [d for d in range(align, target + 1, align) if n % d == 0]
    return max(cands) if cands else n


# ---------------------------------------------------------------------------
# Pallas kernels
# ---------------------------------------------------------------------------
def _conv_stats_kernel(p_ref, w_ref, raw_ref, psum_ref, pssq_ref):
    """One row-tile of the im2col-matmul conv (bf16 operands, f32 accumulate).

    Also emits this tile's per-channel partial sum / sum-of-squares so the
    grid axis stays fully parallel (no resident accumulator)."""
    raw = jnp.dot(p_ref[...], w_ref[...], preferred_element_type=jnp.float32)
    raw_ref[...] = raw
    psum_ref[...] = jnp.sum(raw, axis=0, keepdims=True)[None]        # (1,1,C)
    pssq_ref[...] = jnp.sum(raw * raw, axis=0, keepdims=True)[None]  # (1,1,C)


def _bn_relu_body(x_ref, s_ref, b_ref, o_ref):
    o_ref[...] = jnp.maximum(x_ref[...] * s_ref[...] + b_ref[...], 0.0).astype(o_ref.dtype)


def _bn2_add_relu_proj_body(a_ref, c_ref, sa_ref, ba_ref, sc_ref, bc_ref, o_ref):
    main = a_ref[...] * sa_ref[...] + ba_ref[...]
    short = c_ref[...] * sc_ref[...] + bc_ref[...]
    o_ref[...] = jnp.maximum(main + short, 0.0).astype(o_ref.dtype)


def _bn2_add_relu_id_body(a_ref, c_ref, sa_ref, ba_ref, o_ref):
    # identity shortcut: no BN on the shortcut branch (saves 2 VPU ops + 2 DMAs)
    o_ref[...] = jnp.maximum(a_ref[...] * sa_ref[...] + ba_ref[...] + c_ref[...],
                             0.0).astype(o_ref.dtype)


# ---------------------------------------------------------------------------
# Kernel wrappers
# ---------------------------------------------------------------------------
def conv_matmul_stats(patches, w_flat):
    """patches (M,K) bf16, w_flat (K,C) bf16 -> raw (M,C) f32,
    partial sums / sumsq (n_tiles, 1, C) f32."""
    M, K = patches.shape
    C = w_flat.shape[1]
    tm = _pick_tile(M, CONV_ROW_TILE)
    nt = M // tm
    return pl.pallas_call(
        _conv_stats_kernel,
        out_shape=(
            jax.ShapeDtypeStruct((M, C), jnp.float32),
            jax.ShapeDtypeStruct((nt, 1, C), jnp.float32),
            jax.ShapeDtypeStruct((nt, 1, C), jnp.float32),
        ),
        grid=(nt,),
        in_specs=[
            pl.BlockSpec((tm, K), lambda i: (i, 0)),
            pl.BlockSpec((K, C), lambda i: (0, 0)),   # resident weight slab
        ],
        out_specs=(
            pl.BlockSpec((tm, C), lambda i: (i, 0)),
            pl.BlockSpec((1, 1, C), lambda i: (i, 0, 0)),
            pl.BlockSpec((1, 1, C), lambda i: (i, 0, 0)),
        ),
        compiler_params=pltpu.CompilerParams(
            dimension_semantics=("parallel",),
            vmem_limit_bytes=VMEM_LIMIT),
    )(patches, w_flat)


def _lane_dense_layout(M, C):
    """Reshape (M, C) -> (R, L) with L a multiple of 128 and of C, if possible."""
    total = M * C
    L = C * 128 // math.gcd(C, 128)       # lcm(C, 128)
    if L > total or total % L != 0:
        return None
    return total // L, L


def _elementwise(body, data, params, out_dtype):
    """Fused per-element kernel over (M, C) arrays with (C,) scale/bias vectors,
    run on a lane-dense flattened view when the shapes allow it."""
    M, C = data[0].shape
    layout = _lane_dense_layout(M, C)
    if layout is None:
        R, L = M, C
        d2 = list(data)
        p2 = [p.reshape(1, C) for p in params]
    else:
        R, L = layout
        d2 = [a.reshape(R, L) for a in data]
        p2 = [jnp.tile(p, L // C).reshape(1, L) for p in params]

    rt = _pick_tile(R, ELTWISE_ROW_TILE)
    in_specs = ([pl.BlockSpec((rt, L), lambda i: (i, 0)) for _ in d2]
                + [pl.BlockSpec((1, L), lambda i: (0, 0)) for _ in p2])
    out = pl.pallas_call(
        body,
        out_shape=jax.ShapeDtypeStruct((R, L), out_dtype),
        grid=(R // rt,),
        in_specs=in_specs,
        out_specs=pl.BlockSpec((rt, L), lambda i: (i, 0)),
        compiler_params=pltpu.CompilerParams(
            dimension_semantics=("parallel",),
            vmem_limit_bytes=VMEM_LIMIT),
    )(*d2, *p2)
    return out.reshape(M, C)


def bn_relu(raw, scale, bias):
    # bf16 output: it only feeds conv2's bf16 patch matmul.
    return _elementwise(_bn_relu_body, [raw], [scale, bias], jnp.bfloat16)


def bn2_add_relu_proj(raw2, s2, b2, raw_sc, ssc, bsc):
    return _elementwise(_bn2_add_relu_proj_body, [raw2, raw_sc],
                        [s2, b2, ssc, bsc], jnp.float32)


def bn2_add_relu_identity(raw2, s2, b2, x_flat):
    return _elementwise(_bn2_add_relu_id_body, [raw2, x_flat],
                        [s2, b2], jnp.float32)


# ---------------------------------------------------------------------------
# JAX glue (layout plumbing only)
# ---------------------------------------------------------------------------
def im2col(x_nhwc, k, stride, pad):
    """NHWC -> (N*Ho*Wo, k*k*C) patch matrix (kh-major, then kw, then channel)."""
    N, H, W, C = x_nhwc.shape
    xp = jnp.pad(x_nhwc, ((0, 0), (pad, pad), (pad, pad), (0, 0)))
    Ho = (H + 2 * pad - k) // stride + 1
    Wo = (W + 2 * pad - k) // stride + 1
    cols = []
    for kh in range(k):
        for kw in range(k):
            cols.append(xp[:, kh:kh + stride * Ho:stride, kw:kw + stride * Wo:stride, :])
    p = jnp.concatenate(cols, axis=-1)  # (N, Ho, Wo, k*k*C)
    return p.reshape(N * Ho * Wo, k * k * C), (N, Ho, Wo)


def _flatten_conv_weight(w_oihw):
    """(Cout, Cin, kh, kw) -> (kh*kw*Cin, Cout), matching im2col ordering."""
    kh, kw = w_oihw.shape[2], w_oihw.shape[3]
    cin, cout = w_oihw.shape[1], w_oihw.shape[0]
    return jnp.transpose(w_oihw, (2, 3, 1, 0)).reshape(kh * kw * cin, cout)


def _bn_scale_bias(psum, pssq, count, gamma, beta):
    s = jnp.sum(psum, axis=(0, 1))       # reduce per-tile partials -> (C,)
    q = jnp.sum(pssq, axis=(0, 1))
    mean = s / count
    var = q / count - mean * mean        # biased variance (PyTorch train-mode BN)
    scale = gamma / jnp.sqrt(var + EPS)
    bias = beta - mean * scale
    return scale, bias


def basic_block_forward(x_nchw, params, stride=1):
    """Pallas implementation of BasicBlock.forward (train-mode BatchNorm)."""
    x = jnp.transpose(x_nchw, (0, 2, 3, 1)).astype(jnp.float32)   # NHWC, f32
    N, H, W, Cin = x.shape
    planes = params["w1"].shape[0]
    x_bf = x.astype(jnp.bfloat16)

    # conv1 (3x3, stride s, pad 1) + batch stats
    p1, (_, Ho, Wo) = im2col(x_bf, 3, stride, 1)
    w1 = _flatten_conv_weight(params["w1"]).astype(jnp.bfloat16)
    raw1, s1, q1 = conv_matmul_stats(p1, w1)
    M = N * Ho * Wo
    sc1, b1 = _bn_scale_bias(s1, q1, M, params["bn1_g"], params["bn1_b"])

    # BN1 + ReLU (lane-dense fused elementwise, bf16 out for conv2)
    out1 = bn_relu(raw1, sc1, b1)                                  # (M, planes) bf16

    # conv2 (3x3, stride 1, pad 1) + batch stats
    p2, _ = im2col(out1.reshape(N, Ho, Wo, planes), 3, 1, 1)
    w2 = _flatten_conv_weight(params["w2"]).astype(jnp.bfloat16)
    raw2, s2, q2 = conv_matmul_stats(p2, w2)
    sc2, b2 = _bn_scale_bias(s2, q2, M, params["bn2_g"], params["bn2_b"])

    # shortcut + fused BN2 (+ shortcut BN) + residual add + ReLU
    if stride != 1 or Cin != planes:
        xs = x_bf[:, ::stride, ::stride, :].reshape(M, Cin)        # 1x1 conv = matmul
        wsc = _flatten_conv_weight(params["wsc"]).astype(jnp.bfloat16)
        raw_sc, ss, qs = conv_matmul_stats(xs, wsc)
        scs, bs = _bn_scale_bias(ss, qs, M, params["bnsc_g"], params["bnsc_b"])
        out = bn2_add_relu_proj(raw2, sc2, b2, raw_sc, scs, bs)
    else:
        out = bn2_add_relu_identity(raw2, sc2, b2, x.reshape(M, planes))

    out = out.reshape(N, Ho, Wo, planes)
    return jnp.transpose(out, (0, 3, 1, 2))                        # back to NCHW


# ---------------------------------------------------------------------------
# Pure-JAX reference (bf16 conv operands / f32 accumulation, same as kernels)
# ---------------------------------------------------------------------------
def reference_forward(x_nchw, params, stride=1):
    x = jnp.transpose(x_nchw, (0, 2, 3, 1)).astype(jnp.float32)

    def conv(z, w, s, pad):
        wh = jnp.transpose(w, (2, 3, 1, 0)).astype(jnp.bfloat16)   # HWIO
        return lax.conv_general_dilated(
            z.astype(jnp.bfloat16), wh, (s, s), ((pad, pad), (pad, pad)),
            dimension_numbers=("NHWC", "HWIO", "NHWC"),
            preferred_element_type=jnp.float32)

    def bn(z, g, b):
        mean = jnp.mean(z, axis=(0, 1, 2))
        var = jnp.mean((z - mean) ** 2, axis=(0, 1, 2))
        return (z - mean) / jnp.sqrt(var + EPS) * g + b

    planes = params["w1"].shape[0]
    out = jax.nn.relu(bn(conv(x, params["w1"], stride, 1), params["bn1_g"], params["bn1_b"]))
    out = bn(conv(out, params["w2"], 1, 1), params["bn2_g"], params["bn2_b"])
    if stride != 1 or x.shape[-1] != planes:
        sc = bn(conv(x, params["wsc"], stride, 0), params["bnsc_g"], params["bnsc_b"])
    else:
        sc = x
    out = jax.nn.relu(out + sc)
    return jnp.transpose(out, (0, 3, 1, 2))


# ---------------------------------------------------------------------------
def make_params(key, in_planes, planes, stride):
    ks = jax.random.split(key, 8)
    params = {
        "w1": 0.2 * jax.random.normal(ks[0], (planes, in_planes, 3, 3), jnp.float32),
        "bn1_g": 1.0 + 0.1 * jax.random.normal(ks[1], (planes,), jnp.float32),
        "bn1_b": 0.1 * jax.random.normal(ks[2], (planes,), jnp.float32),
        "w2": 0.2 * jax.random.normal(ks[3], (planes, planes, 3, 3), jnp.float32),
        "bn2_g": 1.0 + 0.1 * jax.random.normal(ks[4], (planes,), jnp.float32),
        "bn2_b": 0.1 * jax.random.normal(ks[5], (planes,), jnp.float32),
    }
    if stride != 1 or in_planes != planes:
        params["wsc"] = 0.2 * jax.random.normal(ks[6], (planes, in_planes, 1, 1), jnp.float32)
        params["bnsc_g"] = 1.0 + 0.1 * jax.random.normal(ks[7], (planes,), jnp.float32)
        params["bnsc_b"] = jnp.zeros((planes,), jnp.float32)
    return params


if __name__ == "__main__":
    key = jax.random.PRNGKey(0)
    TOL = dict(rtol=1e-2, atol=1e-2)   # bf16 matmul operands -> ~1e-3-level diffs

    # Case 1: projection shortcut (in_planes != planes), stride 1.
    k1, k2, k3, k4 = jax.random.split(key, 4)
    x1 = jax.random.normal(k1, (2, 4, 16, 16), jnp.float32)        # NCHW
    p1 = make_params(k2, in_planes=4, planes=8, stride=1)
    out1 = jax.block_until_ready(basic_block_forward(x1, p1, stride=1))
    ref1 = reference_forward(x1, p1, stride=1)
    assert out1.shape == (2, 8, 16, 16)
    assert jnp.allclose(out1, ref1, **TOL), "mismatch (projection case)"

    # Case 2: identity shortcut (in_planes == planes, stride 1).
    x2 = jax.random.normal(k3, (2, 8, 16, 16), jnp.float32)
    p2 = make_params(k4, in_planes=8, planes=8, stride=1)
    out2 = jax.block_until_ready(basic_block_forward(x2, p2, stride=1))
    ref2 = reference_forward(x2, p2, stride=1)
    assert out2.shape == (2, 8, 16, 16)
    assert jnp.allclose(out2, ref2, **TOL), "mismatch (identity case)"

    # Case 3: strided projection shortcut (stride 2).
    p3 = make_params(k2, in_planes=4, planes=8, stride=2)
    out3 = jax.block_until_ready(basic_block_forward(x1, p3, stride=2))
    ref3 = reference_forward(x1, p3, stride=2)
    assert out3.shape == (2, 8, 8, 8)
    assert jnp.allclose(out3, ref3, **TOL), "mismatch (stride-2 case)"

    print("KERNEL_OK")
</pallas_src>

<mosaic_0001>
module attributes {stable_mosaic.version = 11 : i64} {
  func.func @_conv_stats_kernel(%arg0: i32, %arg1: memref<256x36xbf16, #tpu.memory_space<vmem>>, %arg2: memref<36x8xbf16, #tpu.memory_space<vmem>>, %arg3: memref<256x8xf32, #tpu.memory_space<vmem>>, %arg4: memref<1x1x8xf32, #tpu.memory_space<vmem>>, %arg5: memref<1x1x8xf32, #tpu.memory_space<vmem>>) attributes {dimension_semantics = [#tpu.dimension_semantics<parallel>], iteration_bounds = array<i64: 2>, scalar_prefetch = 0 : i64, scratch_operands = 0 : i64, tpu.core_type = #tpu.core_type<tc>, window_params = [{transform_indices = @transform_0, window_bounds = array<i64: 256, 36>}, {pipeline_mode = #tpu.pipeline_mode<synchronous>, transform_indices = @transform_1, window_bounds = array<i64: 36, 8>}, {transform_indices = @transform_2, window_bounds = array<i64: 256, 8>}, {transform_indices = @transform_3, window_bounds = array<i64: 1, 1, 8>}, {transform_indices = @transform_4, window_bounds = array<i64: 1, 1, 8>}]} {
    %c0 = arith.constant 0 : index
    %c0_0 = arith.constant 0 : index
    %0 = vector.load %arg1[%c0, %c0_0] : memref<256x36xbf16, #tpu.memory_space<vmem>>, vector<256x36xbf16>
    %c0_1 = arith.constant 0 : index
    %c0_2 = arith.constant 0 : index
    %1 = vector.load %arg2[%c0_1, %c0_2] : memref<36x8xbf16, #tpu.memory_space<vmem>>, vector<36x8xbf16>
    %cst = arith.constant dense<0.000000e+00> : vector<256x8xf32>
    %2 = tpu.matmul %0, %1, %cst {dimension_numbers = #tpu.dot_dimension_numbers<[1], [0], [0], [1], [0, 0, 1, 1], [], []>} : vector<256x36xbf16>, vector<36x8xbf16>, vector<256x8xf32> -> vector<256x8xf32>
    %c0_3 = arith.constant 0 : index
    %c0_4 = arith.constant 0 : index
    %3 = vector.load %arg3[%c0_3, %c0_4] : memref<256x8xf32, #tpu.memory_space<vmem>>, vector<256x8xf32>
    tpu.vector_store %arg3[%c0_3, %c0_4], %2 {strides = array<i32>} : memref<256x8xf32, #tpu.memory_space<vmem>>, vector<256x8xf32>,
    %cst_5 = arith.constant dense<0.000000e+00> : vector<8xf32>
    %4 = vector.multi_reduction <add>, %2, %cst_5 [0] : vector<256x8xf32> to vector<8xf32>
    %5 = vector.shape_cast %4 : vector<8xf32> to vector<1x8xf32>
    %6 = vector.shape_cast %5 : vector<1x8xf32> to vector<1x1x8xf32>
    %c0_6 = arith.constant 0 : index
    %c0_7 = arith.constant 0 : index
    %c0_8 = arith.constant 0 : index
    %7 = vector.load %arg4[%c0_6, %c0_7, %c0_8] : memref<1x1x8xf32, #tpu.memory_space<vmem>>, vector<1x1x8xf32>
    tpu.vector_store %arg4[%c0_6, %c0_7, %c0_8], %6 {strides = array<i32>} : memref<1x1x8xf32, #tpu.memory_space<vmem>>, vector<1x1x8xf32>,
    %8 = arith.mulf %2, %2 : vector<256x8xf32>
    %cst_9 = arith.constant dense<0.000000e+00> : vector<8xf32>
    %9 = vector.multi_reduction <add>, %8, %cst_9 [0] : vector<256x8xf32> to vector<8xf32>
    %10 = vector.shape_cast %9 : vector<8xf32> to vector<1x8xf32>
    %11 = vector.shape_cast %10 : vector<1x8xf32> to vector<1x1x8xf32>
    %c0_10 = arith.constant 0 : index
    %c0_11 = arith.constant 0 : index
    %c0_12 = arith.constant 0 : index
    %12 = vector.load %arg5[%c0_10, %c0_11, %c0_12] : memref<1x1x8xf32, #tpu.memory_space<vmem>>, vector<1x1x8xf32>
    tpu.vector_store %arg5[%c0_10, %c0_11, %c0_12], %11 {strides = array<i32>} : memref<1x1x8xf32, #tpu.memory_space<vmem>>, vector<1x1x8xf32>,
    return
  }
  func.func @transform_0(%arg0: i32) -> (i32, i32) {
    %c0_i32 = arith.constant 0 : i32
    %c0_i32_0 = arith.constant 0 : i32
    return %arg0, %c0_i32 : i32, i32
  }
  func.func @transform_1(%arg0: i32) -> (i32, i32) {
    %c0_i32 = arith.constant 0 : i32
    %c0_i32_0 = arith.constant 0 : i32
    %c0_i32_1 = arith.constant 0 : i32
    return %c0_i32, %c0_i32_0 : i32, i32
  }
  func.func @transform_2(%arg0: i32) -> (i32, i32) {
    %c0_i32 = arith.constant 0 : i32
    %c0_i32_0 = arith.constant 0 : i32
    return %arg0, %c0_i32 : i32, i32
  }
  func.func @transform_3(%arg0: i32) -> (i32, i32, i32) {
    %c0_i32 = arith.constant 0 : i32
    %c0_i32_0 = arith.constant 0 : i32
    %c0_i32_1 = arith.constant 0 : i32
    return %arg0, %c0_i32, %c0_i32_0 : i32, i32, i32
  }
  func.func @transform_4(%arg0: i32) -> (i32, i32, i32) {
    %c0_i32 = arith.constant 0 : i32
    %c0_i32_0 = arith.constant 0 : i32
    %c0_i32_1 = arith.constant 0 : i32
    return %arg0, %c0_i32, %c0_i32_0 : i32, i32, i32
  }
}

</mosaic_0001>

<bundles_post_ra>
// kernel: tpu_custom_call.1
= control target key start
LH: loop header
LB: loop body
LE: loop exit
PB: predicated region body
PF: predicated region fallthrough
CT: control target
= control target key end

     0   :  { %10 = vsyncpa [#allocation3], 0  ;;  %s1627_s0 = inlined_call_operand.vmem [shape: bf16[512,36], index: 0, kind: input, shape index: {}]   ;;  %s1628_s1 = inlined_call_operand.vmem [shape: bf16[36,8], index: 1, kind: input, shape index: {}]   ;;  %s1629_s2 = inlined_call_operand.vmem [shape: f32[512,8], index: 2, kind: output, shape index: {0}]   ;;  %s1630_s3 = inlined_call_operand.hbm [shape: f32[2,1,8], index: 3, kind: output, shape index: {1}]   ;;  %s1631_s4 = inlined_call_operand.hbm [shape: f32[2,1,8], index: 4, kind: output, shape index: {2}]  }
   0x1   :  { %12 = vsyncpa [#allocation3 + $0x1], 0 }
   0x2   :  { %13 = vsyncpa [#allocation5], 0 }
   0x3   :  { %15 = vsyncpa [#allocation5 + $0x1], 0  ;;  %s1214_s15 = smov 0   ;;  %s1216_s16 = smov 0  }
   0x4   :  { %s1218_s17 = smov 0   ;;  %s1220_s18 = smov 0  }
   0x5 LB: > { %s1235_s19 = sadd.s32 4294967295, %s1185_s18   ;;  %s920_s20 = sadd.s32 4294967294, %s1185_s18   ;;  %s1185_s18 = sphi %s1220_s18, %s1637_s18   ;;  %s1181_s17 = sphi %s1218_s17, %s1636_s17   ;;  %s1177_s16 = sphi %s1216_s16, %s1635_s16   ;;  %s1173_s15 = sphi %s1214_s15, %s1634_s15  }
   0x6   : > { %s1239_s21 = sadd.s32 1, %s1185_s18   ;;  %s101_s22 = sadd.s32 1, %s1181_s17 }
   0x7   : > { %s98_s23 = ssub.s32 %s1185_s18, %s1239_s21  ;;  %p111_p0 = scmp.ne.s32.totalorder %s1181_s17, %s1177_s16 }
   0x8   : > { %p99_p1 = scmp.eq.s32.totalorder %s98_s23, 0  ;;  %p112_p2 = scmp.eq.s32.totalorder %s1235_s19, 1 }
   0x9   : > { %p117_p3 = scmp.ne.s32.totalorder %s1177_s16, %s1173_s15  ;;  %p118_p4 = scmp.eq.s32.totalorder %s920_s20, 1 }
   0xa   : > { %s1250_s24 = scalar_select %p99_p1, %s1181_s17, %s101_s22  }
   0xb   : > { %p1252_p5 = por %p112_p2, %p111_p0  ;;  %p1256_p6 = por %p118_p4, %p117_p3 }
   0xc   : > { %p923_p7 = scmp.ge.s32.totalorder %s1185_s18, 1  ;;  %p174_p8 = scmp.lt.s32.totalorder %s1185_s18, 3 }
   0xe   : > { %p175_p9 = pnand %p923_p7, %p174_p8 }
   0xf   : > { %s924_s5 = sshll.u32 (!%p175_p9), %s1235_s19, 5  ;;  %s1543_s22 = sand.u32 (!%p175_p9), 1, %s1177_s16  }
  0x10   : > { %178 = sbr.rel (%p175_p9) target bundleno = 343 (0x157), region = 28  ;;  %p209_p10 = scmp.lt.s32.totalorder (!%p175_p9), %s924_s5, 63 }
  0x11   : > { %s963_s23 = sshll.u32 (!%p175_p9), %s1235_s19, 4  ;;  %s201_s27 = scalar_lea.vmem (!%p175_p9), [#allocation2], %s1543_s22 }
  0x12   : > { %s799_s28 = sshll.u32 (!%p175_p9), %s201_s27, 4  ;;  %s207_s29 = scalar_lea.vmem (!%p175_p9), [#allocation4], %s1543_s22  ;;  %s1555_s28 = int_to_ptr.vmem [resolvable:$true] %s799_s28 }
  0x13   : > { %s812_s30 = sshll.u32 (!%p175_p9), %s207_s29, 4  ;;  %s1553_s7 = scalar_lea.hbm (!%p175_p9), %s1630_s3, %s963_s23  ;;  %s1563_s30 = int_to_ptr.vmem [resolvable:$true] %s812_s30 }
  0x14   : > { %s1561_s9 = scalar_lea.hbm (!%p175_p9), %s1631_s4, %s963_s23  ;;  %s779_s10 = scalar_lea.sflag (!%p175_p9), [#allocation3], %s1543_s22 }
  0x15   : > { %v1076_v0 = vld [vmem:[%s1628_s1 + $0x10] ss:$0 sps:$4 sm:$0x33]   ;;  %vm402_vm0 = vcmask 1041408   ;;  %v1077_v1 = vld [vmem:[%s1628_s1 + $0x8] sm:$0xff]   ;;  %v1078_v3 = vld [vmem:[%s1628_s1] sm:$0xff]  }
  0x16   : > { %1030 = vmatprep.subr.msk.bf16.mxu0 %vm402_vm0, %v1076_v0  ;;  %v404_v2 = vsel %vm402_vm0, %v1076_v0, 0  ;;  %1031 = vmatprep.subr.msk.bf16.mxu1 %vm402_vm0, %v1076_v0  ;;  %s1639_s5 = smov (!%p209_p10, %s924_s5), 63  ;;  %vm353_vm1 = vcmask 293888   ;;  %vm567_vm2 = vcmask 64512   ;;  %vm669_vm3 = vcmask 57344  }
  0x17   : > { %987 = vmatpush3.bf16.msra.mxu0 %v404_v2  ;;  %1027 = vmatpush3.bf16.msra.mxu1 %v404_v2  ;;  %s925_s8 = sshll.u32 %s1639_s5, 2  ;;  %s927_s12 = sshll.u32 %s1639_s5, 3 }
  0x18   : > { %988 = vmatprep.subr.bf16.mxu0 %v1077_v1  ;;  %1025 = vmatprep.subr.bf16.mxu1 %v1077_v1  ;;  %s1278_s11 = scalar_lea.vmem %s1627_s0, %s925_s8  ;;  %s1316_s20 = scalar_lea.vmem %s1629_s2, %s927_s12 }
  0x19   : > { %v1079_v4 = vld [vmem:[%s1278_s11] sm:$0xff]   ;;  %v1080_v5 = vld [vmem:[%s1278_s11 + $0x8] sm:$0xff]   ;;  %v1081_v6 = vld [vmem:[%s1278_s11 + $0x10] sm:$0xff]   ;;  %s1187_s12 = smov [#allocation2]  }
  0x1a   : > { %992 = vmatprep.mubr.msk.bf16.mxu0 %vm353_vm1, %v1079_v4  ;;  %v1082_v7 = vld [vmem:[%s1278_s11 + $0x18] sm:$0xff]   ;;  %v1083_v8 = vld [vmem:[%s1278_s11 + $0x20] sm:$0xff]   ;;  %v1088_v10 = vld [vmem:[%s1278_s11 + $0x48] sm:$0xff]   ;;  %s1099_s13 = sshll.u32 %s1187_s12, 4  ;;  %s1100_s13 = int_to_ptr.vmem [resolvable:$false] %s1099_s13 }
  0x1b   : > { %989 = vmatpush3.bf16.msra.mxu0 %v1077_v1  ;;  %1028 = vmatpush3.bf16.msra.mxu1 %v1077_v1  ;;  %v1087_v9 = vld [vmem:[%s1278_s11 + $0x40] sm:$0xff]   ;;  %v1089_v11 = vld [vmem:[%s1278_s11 + $0x50] sm:$0xff]   ;;  %v1090_v12 = vld [vmem:[%s1278_s11 + $0x58] sm:$0xff]   ;;  %s1101_s14 = scalar_lea.vmem %s1100_s13, 32  ;;  %p1102_p0 = scmp.lt.s32.totalorder %s1555_s28, %s1100_s13 }
  0x1c   : > { %990 = vmatprep.subr.bf16.mxu0 %v1078_v3  ;;  %1026 = vmatprep.subr.bf16.mxu1 %v1078_v3  ;;  %v1091_v13 = vld [vmem:[%s1278_s11 + $0x60] sm:$0xff]   ;;  %v1084_v14 = vld [vmem:[%s1278_s11 + $0x28] sm:$0xff]   ;;  %v1085_v15 = vld [vmem:[%s1278_s11 + $0x30] sm:$0xff]  }
  0x1d   : > { %1008 = vmatprep.mubr.msk.bf16.mxu1 %vm353_vm1, %v1087_v9  ;;  %v1092_v16 = vld [vmem:[%s1278_s11 + $0x68] sm:$0xff]   ;;  %v1093_v17 = vld [vmem:[%s1278_s11 + $0x70] sm:$0xff]   ;;  %v1086_v18 = vld [vmem:[%s1278_s11 + $0x38] sm:$0xff]  }
  0x1e   : > { %v1094_v19 = vld [vmem:[%s1278_s11 + $0x78] sm:$0xff]   ;;  %s1095_s11 = scalar_lea.vmem %s1555_s28, 16 }
  0x1f   : > { %991 = vmatpush3.bf16.msra.mxu0 %v1078_v3  ;;  %1029 = vmatpush3.bf16.msra.mxu1 %v1078_v3  ;;  %p1096_p11 = scmp.ne.s32.totalorder %s1555_s28, %s1095_s11  ;;  %p1103_p1 = scmp.lt.s32.totalorder %s1101_s14, %s1095_s11 }
  0x21   : > { %p1097_p12 = pnand %p1096_p11, %p1252_p5  ;;  %p1104_p2 = por %p1103_p1, %p1102_p0 }
  0x22   : > { %993 = vmatmul.mubr.msk.bf16.vlgmr.msra.gmra.mxu0 %vm353_vm1, %v1080_v5  ;;  %1009 = vmatmul.mubr.msk.bf16.vlgmr.msra.gmra.mxu1 %vm353_vm1, %v1088_v10 }
  0x23   : > { %996 = vmatprep.mubr.msk.bf16.mxu0 %vm353_vm1, %v1081_v6  ;;  %1012 = vmatprep.mubr.msk.bf16.mxu1 %vm353_vm1, %v1089_v11  ;;  %p1098_p13 = pneg %p1097_p12 }
  0x25   : > { %p1105_p3 = pnand %p1104_p2, %p1098_p13 }
  0x2a   : > { %997 = vmatmul.mubr.msk.bf16.gmra.mxu0 %vm353_vm1, %v1082_v7  ;;  %1013 = vmatmul.mubr.msk.bf16.gmra.mxu1 %vm353_vm1, %v1090_v12 }
  0x2b   : > { %1000 = vmatprep.mubr.msk.bf16.mxu0 %vm353_vm1, %v1083_v8  ;;  %1016 = vmatprep.mubr.msk.bf16.mxu1 %vm353_vm1, %v1091_v13 }
  0x32   : > { %1001 = vmatmul.mubr.msk.bf16.gmra.mxu0 %vm353_vm1, %v1084_v14  ;;  %1017 = vmatmul.mubr.msk.bf16.gmra.mxu1 %vm353_vm1, %v1092_v16 }
  0x33   : > { %1004 = vmatprep.mubr.msk.bf16.mxu0 %vm353_vm1, %v1085_v15  ;;  %1020 = vmatprep.mubr.msk.bf16.mxu1 %vm353_vm1, %v1093_v17 }
  0x3a   : > { %1005 = vmatmul.mubr.msk.bf16.gmra.mxu0 %vm353_vm1, %v1086_v18  ;;  %1021 = vmatmul.mubr.msk.bf16.gmra.mxu1 %vm353_vm1, %v1094_v19 }
  0xe2   : > { %v994_v20 = vpop.f32.mrf.mxu0  ;;  %v1324_v25 = vpop.f32.mrf.mxu1 }
  0xe3   : > { %570 = vst.msk [vmem:[%s1316_s20 + $0x10] sm:$0xff] %vm567_vm2, %v994_v20  ;;  %v673_v26 = vmul.f32 %v994_v20, %v994_v20  ;;  %586 = vst.msk [vmem:[%s1316_s20 + $0x90] sm:$0xff] %vm567_vm2, %v1324_v25  ;;  %v603_v33 = vsel %vm567_vm2, %v994_v20, 0.0 }
  0xe4   : > { %v440_v21 = vpop.f32.mrf.mxu0  ;;  %v1333_v32 = vpop.f32.mrf.mxu1 }
  0xe5   : > { %568 = vst.msk [vmem:[%s1316_s20] sm:$0xff] %vm567_vm2, %v440_v21  ;;  %v671_v23 = vmul.f32 %v440_v21, %v440_v21  ;;  %v600_v27 = vsel %vm567_vm2, %v440_v21, 0.0  ;;  %584 = vst.msk [vmem:[%s1316_s20 + $0x80] sm:$0xff] %vm567_vm2, %v1333_v32  ;;  %v706_v41 = vsel %vm567_vm2, %v673_v26, 0.0 }
  0xe6   : > { %v995_v22 = vpop.f32.mrf.mxu0  ;;  %v1343_v40 = vpop.f32.mrf.mxu1 }
  0xe7   : > { %571 = vst.msk [vmem:[%s1316_s20 + $0x18] sm:$0xff] %vm567_vm2, %v995_v22  ;;  %v703_v34 = vsel %vm567_vm2, %v671_v23, 0.0  ;;  %v674_v35 = vmul.f32 %v995_v22, %v995_v22  ;;  %v605_v42 = vsel %vm567_vm2, %v995_v22, 0.0  ;;  %587 = vst.msk [vmem:[%s1316_s20 + $0x98] sm:$0xff] %vm567_vm2, %v1343_v40 }
  0xe8   : > { %v443_v24 = vpop.f32.mrf.mxu0  ;;  %v1352_v47 = vpop.f32.mrf.mxu1 }
  0xe9   : > { %569 = vst.msk [vmem:[%s1316_s20 + $0x8] sm:$0xff] %vm567_vm2, %v443_v24  ;;  %v601_v28 = vsel %vm567_vm2, %v443_v24, 0.0  ;;  %v672_v29 = vmul.f32 %v443_v24, %v443_v24  ;;  %v708_v48 = vsel %vm567_vm2, %v674_v35, 0.0  ;;  %585 = vst.msk [vmem:[%s1316_s20 + $0x88] sm:$0xff] %vm567_vm2, %v1352_v47 }
  0xea   : > { %v602_v30 = vadd.f32 %v601_v28, %v600_v27  ;;  %v998_v31 = vpop.f32.mrf.mxu0  ;;  %v1361_v53 = vpop.f32.mrf.mxu1 }
  0xeb   : > { %v704_v36 = vsel %vm567_vm2, %v672_v29, 0.0  ;;  %574 = vst.msk [vmem:[%s1316_s20 + $0x30] sm:$0xff] %vm567_vm2, %v998_v31  ;;  %v677_v54 = vmul.f32 %v998_v31, %v998_v31  ;;  %590 = vst.msk [vmem:[%s1316_s20 + $0xb0] sm:$0xff] %vm567_vm2, %v1361_v53  ;;  %v611_v62 = vsel %vm567_vm2, %v998_v31, 0.0 }
  0xec   : > { %v604_v37 = vadd.f32 %v603_v33, %v602_v30  ;;  %v705_v38 = vadd.f32 %v704_v36, %v703_v34  ;;  %v456_v39 = vpop.f32.mrf.mxu0  ;;  %v1370_v61 = vpop.f32.mrf.mxu1 }
  0xed   : > { %572 = vst.msk [vmem:[%s1316_s20 + $0x20] sm:$0xff] %vm567_vm2, %v456_v39  ;;  %v675_v43 = vmul.f32 %v456_v39, %v456_v39  ;;  %v607_v49 = vsel %vm567_vm2, %v456_v39, 0.0  ;;  %588 = vst.msk [vmem:[%s1316_s20 + $0xa0] sm:$0xff] %vm567_vm2, %v1370_v61  ;;  %v714_v5 = vsel %vm567_vm2, %v677_v54, 0.0 }
  0xee   : > { %v707_v44 = vadd.f32 %v706_v41, %v705_v38  ;;  %v606_v45 = vadd.f32 %v605_v42, %v604_v37  ;;  %v999_v46 = vpop.f32.mrf.mxu0  ;;  %v1379_v4 = vpop.f32.mrf.mxu1 }
  0xef   : > { %575 = vst.msk [vmem:[%s1316_s20 + $0x38] sm:$0xff] %vm567_vm2, %v999_v46  ;;  %v710_v55 = vsel %vm567_vm2, %v675_v43, 0.0  ;;  %v678_v63 = vmul.f32 %v999_v46, %v999_v46  ;;  %v613_v6 = vsel %vm567_vm2, %v999_v46, 0.0  ;;  %591 = vst.msk [vmem:[%s1316_s20 + $0xb8] sm:$0xff] %vm567_vm2, %v1379_v4 }
  0xf0   : > { %v608_v50 = vadd.f32 %v607_v49, %v606_v45  ;;  %v709_v51 = vadd.f32 %v708_v48, %v707_v44  ;;  %v459_v52 = vpop.f32.mrf.mxu0  ;;  %v1388_v11 = vpop.f32.mrf.mxu1 }
  0xf1   : > { %573 = vst.msk [vmem:[%s1316_s20 + $0x28] sm:$0xff] %vm567_vm2, %v459_v52  ;;  %v609_v56 = vsel %vm567_vm2, %v459_v52, 0.0  ;;  %v676_v57 = vmul.f32 %v459_v52, %v459_v52  ;;  %v716_v12 = vsel %vm567_vm2, %v678_v63, 0.0  ;;  %589 = vst.msk [vmem:[%s1316_s20 + $0xa8] sm:$0xff] %vm567_vm2, %v1388_v11 }
  0xf2   : > { %v711_v58 = vadd.f32 %v710_v55, %v709_v51  ;;  %v610_v59 = vadd.f32 %v609_v56, %v608_v50  ;;  %v1002_v60 = vpop.f32.mrf.mxu0  ;;  %v1397_v17 = vpop.f32.mrf.mxu1 }
  0xf3   : > { %v712_v0 = vsel %vm567_vm2, %v676_v57, 0.0  ;;  %578 = vst.msk [vmem:[%s1316_s20 + $0x50] sm:$0xff] %vm567_vm2, %v1002_v60  ;;  %v681_v18 = vmul.f32 %v1002_v60, %v1002_v60  ;;  %594 = vst.msk [vmem:[%s1316_s20 + $0xd0] sm:$0xff] %vm567_vm2, %v1397_v17  ;;  %v619_v27 = vsel %vm567_vm2, %v1002_v60, 0.0 }
  0xf4   : > { %v612_v1 = vadd.f32 %v611_v62, %v610_v59  ;;  %v713_v2 = vadd.f32 %v712_v0, %v711_v58  ;;  %v472_v3 = vpop.f32.mrf.mxu0  ;;  %v1406_v26 = vpop.f32.mrf.mxu1 }
  0xf5   : > { %576 = vst.msk [vmem:[%s1316_s20 + $0x40] sm:$0xff] %vm567_vm2, %v472_v3  ;;  %v679_v7 = vmul.f32 %v472_v3, %v472_v3  ;;  %v615_v13 = vsel %vm567_vm2, %v472_v3, 0.0  ;;  %592 = vst.msk [vmem:[%s1316_s20 + $0xc0] sm:$0xff] %vm567_vm2, %v1406_v26  ;;  %v722_v35 = vsel %vm567_vm2, %v681_v18, 0.0  ;;  %v687_v3 = vmul.f32 %v1333_v32, %v1333_v32 }
  0xf6   : > { %v715_v8 = vadd.f32 %v714_v5, %v713_v2  ;;  %v614_v9 = vadd.f32 %v613_v6, %v612_v1  ;;  %v1003_v10 = vpop.f32.mrf.mxu0  ;;  %v1415_v34 = vpop.f32.mrf.mxu1 }
  0xf7   : > { %579 = vst.msk [vmem:[%s1316_s20 + $0x58] sm:$0xff] %vm567_vm2, %v1003_v10  ;;  %v718_v19 = vsel %vm567_vm2, %v679_v7, 0.0  ;;  %v682_v28 = vmul.f32 %v1003_v10, %v1003_v10  ;;  %v621_v36 = vsel %vm567_vm2, %v1003_v10, 0.0  ;;  %595 = vst.msk [vmem:[%s1316_s20 + $0xd8] sm:$0xff] %vm567_vm2, %v1415_v34  ;;  %v688_v10 = vmul.f32 %v1352_v47, %v1352_v47 }
  0xf8   : > { %v616_v14 = vadd.f32 %v615_v13, %v614_v9  ;;  %v717_v15 = vadd.f32 %v716_v12, %v715_v8  ;;  %v475_v16 = vpop.f32.mrf.mxu0  ;;  %v1424_v42 = vpop.f32.mrf.mxu1  ;;  %v631_v9 = vsel %vm567_vm2, %v1333_v32, 0.0  ;;  %v635_v32 = vsel %vm567_vm2, %v1324_v25, 0.0 }
  0xf9   : > { %577 = vst.msk [vmem:[%s1316_s20 + $0x48] sm:$0xff] %vm567_vm2, %v475_v16  ;;  %v617_v20 = vsel %vm567_vm2, %v475_v16, 0.0  ;;  %v680_v21 = vmul.f32 %v475_v16, %v475_v16  ;;  %v724_v43 = vsel %vm567_vm2, %v682_v28, 0.0  ;;  %593 = vst.msk [vmem:[%s1316_s20 + $0xc8] sm:$0xff] %vm567_vm2, %v1424_v42  ;;  %v633_v16 = vsel %vm567_vm2, %v1352_v47, 0.0 }
  0xfa   : > { %v719_v22 = vadd.f32 %v718_v19, %v717_v15  ;;  %v618_v23 = vadd.f32 %v617_v20, %v616_v14  ;;  %v1006_v24 = vpop.f32.mrf.mxu0  ;;  %v1433_v49 = vpop.f32.mrf.mxu1  ;;  %v689_v14 = vmul.f32 %v1324_v25, %v1324_v25  ;;  %v734_v15 = vsel %vm567_vm2, %v687_v3, 0.0 }
  0xfb   : > { %v720_v29 = vsel %vm567_vm2, %v680_v21, 0.0  ;;  %582 = vst.msk [vmem:[%s1316_s20 + $0x70] sm:$0xff] %vm567_vm2, %v1006_v24  ;;  %v685_v50 = vmul.f32 %v1006_v24, %v1006_v24  ;;  %598 = vst.msk [vmem:[%s1316_s20 + $0xf0] sm:$0xff] %vm567_vm2, %v1433_v49  ;;  %v627_v58 = vsel %vm567_vm2, %v1006_v24, 0.0  ;;  %v690_v20 = vmul.f32 %v1343_v40, %v1343_v40 }
  0xfc   : > { %v620_v30 = vadd.f32 %v619_v27, %v618_v23  ;;  %v721_v31 = vadd.f32 %v720_v29, %v719_v22  ;;  %v488_v33 = vpop.f32.mrf.mxu0  ;;  %v1442_v57 = vpop.f32.mrf.mxu1  ;;  %v736_v21 = vsel %vm567_vm2, %v688_v10, 0.0  ;;  %v738_v24 = vsel %vm567_vm2, %v689_v14, 0.0 }
  0xfd   : > { %580 = vst.msk [vmem:[%s1316_s20 + $0x60] sm:$0xff] %vm567_vm2, %v488_v33  ;;  %v683_v37 = vmul.f32 %v488_v33, %v488_v33  ;;  %v623_v44 = vsel %vm567_vm2, %v488_v33, 0.0  ;;  %596 = vst.msk [vmem:[%s1316_s20 + $0xe0] sm:$0xff] %vm567_vm2, %v1442_v57  ;;  %v730_v1 = vsel %vm567_vm2, %v685_v50, 0.0  ;;  %v637_v27 = vsel %vm567_vm2, %v1343_v40, 0.0 }
  0xfe   : > { %v723_v38 = vadd.f32 %v722_v35, %v721_v31  ;;  %v622_v39 = vadd.f32 %v621_v36, %v620_v30  ;;  %v1007_v41 = vpop.f32.mrf.mxu0  ;;  %v1449_v0 = vpop.f32.mrf.mxu1  ;;  %v691_v47 = vmul.f32 %v1370_v61, %v1370_v61  ;;  %v740_v30 = vsel %vm567_vm2, %v690_v20, 0.0 }
  0xff   : > { %583 = vst.msk [vmem:[%s1316_s20 + $0x78] sm:$0xff] %vm567_vm2, %v1007_v41  ;;  %v726_v51 = vsel %vm567_vm2, %v683_v37, 0.0  ;;  %v686_v59 = vmul.f32 %v1007_v41, %v1007_v41  ;;  %v629_v2 = vsel %vm567_vm2, %v1007_v41, 0.0  ;;  %599 = vst.msk [vmem:[%s1316_s20 + $0xf8] sm:$0xff] %vm567_vm2, %v1449_v0  ;;  %v639_v25 = vsel %vm567_vm2, %v1370_v61, 0.0 }
 0x100   : > { %v624_v45 = vadd.f32 %v623_v44, %v622_v39  ;;  %v725_v46 = vadd.f32 %v724_v43, %v723_v38  ;;  %v491_v48 = vpop.f32.mrf.mxu0  ;;  %v1458_v7 = vpop.f32.mrf.mxu1  ;;  %v692_v31 = vmul.f32 %v1388_v11, %v1388_v11  ;;  %v693_v36 = vmul.f32 %v1361_v53, %v1361_v53 }
 0x101   : > { %581 = vst.msk [vmem:[%s1316_s20 + $0x68] sm:$0xff] %vm567_vm2, %v491_v48  ;;  %v625_v52 = vsel %vm567_vm2, %v491_v48, 0.0  ;;  %v684_v54 = vmul.f32 %v491_v48, %v491_v48  ;;  %v732_v8 = vsel %vm567_vm2, %v686_v59, 0.0  ;;  %597 = vst.msk [vmem:[%s1316_s20 + $0xe8] sm:$0xff] %vm567_vm2, %v1458_v7  ;;  %v742_v40 = vsel %vm567_vm2, %v691_v47, 0.0 }
 0x102   : > { %v727_v55 = vadd.f32 %v726_v51, %v725_v46  ;;  %v626_v56 = vadd.f32 %v625_v52, %v624_v45  ;;  %v641_v37 = vsel %vm567_vm2, %v1388_v11, 0.0  ;;  %v643_v41 = vsel %vm567_vm2, %v1361_v53, 0.0 }
 0x103   : > { %v728_v60 = vsel %vm567_vm2, %v684_v54, 0.0  ;;  %v694_v61 = vmul.f32 %v1379_v4, %v1379_v4  ;;  %v744_v43 = vsel %vm567_vm2, %v692_v31, 0.0  ;;  %v746_v46 = vsel %vm567_vm2, %v693_v36, 0.0 }
 0x104   : > { %v628_v62 = vadd.f32 %v627_v58, %v626_v56  ;;  %v729_v63 = vadd.f32 %v728_v60, %v727_v55  ;;  %v645_v48 = vsel %vm567_vm2, %v1379_v4, 0.0  ;;  %v695_v11 = vmul.f32 %v1406_v26, %v1406_v26 }
 0x105   : > { %v748_v52 = vsel %vm567_vm2, %v694_v61, 0.0  ;;  %v647_v53 = vsel %vm567_vm2, %v1406_v26, 0.0  ;;  %v696_v54 = vmul.f32 %v1424_v42, %v1424_v42  ;;  %v697_v58 = vmul.f32 %v1397_v17, %v1397_v17 }
 0x106   : > { %v630_v5 = vadd.f32 %v629_v2, %v628_v62  ;;  %v731_v6 = vadd.f32 %v730_v1, %v729_v63  ;;  %v750_v4 = vsel %vm567_vm2, %v695_v11, 0.0  ;;  %v649_v59 = vsel %vm567_vm2, %v1424_v42, 0.0 }
 0x107   : > { %v651_v63 = vsel %vm567_vm2, %v1397_v17, 0.0  ;;  %v698_v26 = vmul.f32 %v1415_v34, %v1415_v34  ;;  %v752_v1 = vsel %vm567_vm2, %v696_v54, 0.0  ;;  %v699_v42 = vmul.f32 %v1442_v57, %v1442_v57 }
 0x108   : > { %v733_v12 = vadd.f32 %v732_v8, %v731_v6  ;;  %v632_v13 = vadd.f32 %v631_v9, %v630_v5  ;;  %v754_v5 = vsel %vm567_vm2, %v697_v58, 0.0  ;;  %v653_v6 = vsel %vm567_vm2, %v1415_v34, 0.0 }
 0x109   : > { %v756_v10 = vsel %vm567_vm2, %v698_v26, 0.0  ;;  %v655_v17 = vsel %vm567_vm2, %v1442_v57, 0.0  ;;  %v758_v34 = vsel %vm567_vm2, %v699_v42, 0.0  ;;  %v702_v57 = vmul.f32 %v1449_v0, %v1449_v0 }
 0x10a   : > { %v634_v18 = vadd.f32 %v633_v16, %v632_v13  ;;  %v735_v19 = vadd.f32 %v734_v15, %v733_v12  ;;  %v700_v12 = vmul.f32 %v1458_v7, %v1458_v7  ;;  %v701_v15 = vmul.f32 %v1433_v49, %v1433_v49 }
 0x10b   : > { %v657_v16 = vsel %vm567_vm2, %v1458_v7, 0.0  ;;  %v764_v47 = vsel %vm567_vm2, %v702_v57, 0.0 }
 0x10c   : > { %v636_v22 = vadd.f32 %v635_v32, %v634_v18  ;;  %v737_v23 = vadd.f32 %v736_v21, %v735_v19  ;;  %v659_v32 = vsel %vm567_vm2, %v1433_v49, 0.0  ;;  %v760_v20 = vsel %vm567_vm2, %v700_v12, 0.0 }
 0x10e   : > { %v739_v28 = vadd.f32 %v738_v24, %v737_v23  ;;  %v638_v29 = vadd.f32 %v637_v27, %v636_v22  ;;  %v762_v23 = vsel %vm567_vm2, %v701_v15, 0.0  ;;  %v661_v24 = vsel %vm567_vm2, %v1449_v0, 0.0 }
 0x110   : > { %v640_v33 = vadd.f32 %v639_v25, %v638_v29  ;;  %v741_v35 = vadd.f32 %v740_v30, %v739_v28 }
 0x112   : > { %v743_v38 = vadd.f32 %v742_v40, %v741_v35  ;;  %v642_v39 = vadd.f32 %v641_v37, %v640_v33 }
 0x114   : > { %v644_v44 = vadd.f32 %v643_v41, %v642_v39  ;;  %v745_v45 = vadd.f32 %v744_v43, %v743_v38 }
 0x116   : > { %v747_v50 = vadd.f32 %v746_v46, %v745_v45  ;;  %v646_v51 = vadd.f32 %v645_v48, %v644_v44 }
 0x118   : > { %v648_v55 = vadd.f32 %v647_v53, %v646_v51  ;;  %v749_v56 = vadd.f32 %v748_v52, %v747_v50 }
 0x11a   : > { %v751_v60 = vadd.f32 %v750_v4, %v749_v56  ;;  %v650_v62 = vadd.f32 %v649_v59, %v648_v55 }
 0x11c   : > { %v652_v2 = vadd.f32 %v651_v63, %v650_v62  ;;  %v753_v3 = vadd.f32 %v752_v1, %v751_v60 }
 0x11e   : > { %v755_v8 = vadd.f32 %v754_v5, %v753_v3  ;;  %v654_v9 = vadd.f32 %v653_v6, %v652_v2 }
 0x120   : > { %v656_v13 = vadd.f32 %v655_v17, %v654_v9  ;;  %v757_v14 = vadd.f32 %v756_v10, %v755_v8 }
 0x122   : > { %v759_v18 = vadd.f32 %v758_v34, %v757_v14  ;;  %v658_v19 = vadd.f32 %v657_v16, %v656_v13 }
 0x124   : > { %v660_v21 = vadd.f32 %v659_v32, %v658_v19  ;;  %v761_v22 = vadd.f32 %v760_v20, %v759_v18 }
 0x126   : > { %v662_v27 = vadd.f32 %v661_v24, %v660_v21  ;;  %v763_v7 = vadd.f32 %v762_v23, %v761_v22 }
 0x128   : > { %v663_v28 = vrot.slane %v662_v27, 4  ;;  %v765_v29 = vadd.f32 %v764_v47, %v763_v7 }
 0x12a   : > { %v664_v49 = vadd.f32 %v663_v28, %v662_v27  ;;  %v766_v30 = vrot.slane %v765_v29, 4 }
 0x12c   : > { %v665_v25 = vrot.slane %v664_v49, 2  ;;  %v767_v31 = vadd.f32 %v766_v30, %v765_v29 }
 0x12e   : > { %v666_v33 = vadd.f32 %v665_v25, %v664_v49  ;;  %v768_v35 = vrot.slane %v767_v31, 2 }
 0x130   : > { %v667_v0 = vrot.slane %v666_v33, 1  ;;  %v769_v36 = vadd.f32 %v768_v35, %v767_v31 }
 0x132   : > { %v668_v40 = vadd.f32 %v667_v0, %v666_v33  ;;  %v770_v37 = vrot.slane %v769_v36, 1 }
 0x134   : > { %670 = vst.msk [vmem:[%s201_s27] sm:$0x1] %vm669_vm3, %v668_v40  ;;  %v771_v38 = vadd.f32 %v770_v37, %v769_v36 }
 0x135   : > { %1108 = shalt.err (!%p1105_p3)
}
 0x136   : > { %s1109_s20 = scalar_lea.hbm %s1553_s7, 16  ;;  %s1113_s5 = scalar_lea.hbm %s1630_s3, 32 }
 0x137   : > { %p1110_p4 = scmp.ne.s32.totalorder %s1553_s7, %s1109_s20  ;;  %p1114_p9 = scmp.lt.s32.totalorder %s1553_s7, %s1630_s3 }
 0x138   : > { %p1115_p10 = scmp.lt.s32.totalorder %s1113_s5, %s1109_s20 }
 0x139   : > { %p1111_p7 = pnand %p1110_p4, %p1252_p5 }
 0x13a   : > { %p1116_p11 = por %p1115_p10, %p1114_p9 }
 0x13b   : > { %p1112_p8 = pneg %p1111_p7 }
 0x13d   : > { %p1117_p12 = pnand %p1116_p11, %p1112_p8 }
 0x13f   : > { %1120 = shalt.err (!%p1117_p12)
}
 0x140   : > { %1032 = dma.vmem_to_hbm [thread:$0]  (%p1252_p5), %s1555_s28, 16, %s1553_s7, %s779_s10   ;;  %772 = vst.msk [vmem:[%s207_s29] sm:$0x1] %vm669_vm3, %v771_v38 }
 0x141   : > { %s783_s8 = scalar_lea.sflag [#allocation5], %s1543_s22  ;;  %s1121_s11 = scalar_lea.vmem %s1563_s30, 16 }
 0x142   : > { %p1122_p13 = scmp.ne.s32.totalorder %s1563_s30, %s1121_s11  ;;  %s1188_s12 = smov [#allocation4]  }
 0x143   : > { %s1125_s13 = sshll.u32 %s1188_s12, 4  ;;  %s1126_s13 = int_to_ptr.vmem [resolvable:$false] %s1125_s13 }
 0x144   : > { %p1123_p0 = pnand %p1122_p13, %p1252_p5  ;;  %s1127_s14 = scalar_lea.vmem %s1126_s13, 32 }
 0x145   : > { %p1128_p2 = scmp.lt.s32.totalorder %s1563_s30, %s1126_s13  ;;  %p1129_p3 = scmp.lt.s32.totalorder %s1127_s14, %s1121_s11 }
 0x146   : > { %p1124_p1 = pneg %p1123_p0 }
 0x147   : > { %p1130_p4 = por %p1129_p3, %p1128_p2 }
 0x149   : > { %p1131_p7 = pnand %p1130_p4, %p1124_p1 }
 0x14b   : > { %1134 = shalt.err (!%p1131_p7)
}
 0x14c   : > { %s1135_s28 = scalar_lea.hbm %s1561_s9, 16  ;;  %s1139_s7 = scalar_lea.hbm %s1631_s4, 32 }
 0x14d   : > { %p1136_p8 = scmp.ne.s32.totalorder %s1561_s9, %s1135_s28  ;;  %p1140_p11 = scmp.lt.s32.totalorder %s1561_s9, %s1631_s4 }
 0x14e   : > { %p1141_p12 = scmp.lt.s32.totalorder %s1139_s7, %s1135_s28 }
 0x14f   : > { %p1137_p9 = pnand %p1136_p8, %p1252_p5 }
 0x150   : > { %p1142_p13 = por %p1141_p12, %p1140_p11 }
 0x151   : > { %p1138_p10 = pneg %p1137_p9 }
 0x153   : > { %p1143_p0 = pnand %p1142_p13, %p1138_p10 }
 0x155   : > { %1146 = shalt.err (!%p1143_p0)
}
 0x156   : > { %1033 = dma.vmem_to_hbm [thread:$0]  (%p1252_p5), %s1563_s30, 16, %s1561_s9, %s783_s8  }
 0x157 PF: > { %p1043_p1 = scmp.ge.s32.totalorder %s1185_s18, 2  ;;  %s832_s23 = sand.u32 1, %s1173_s15  }
 0x158   : > { %s833_s27 = scalar_lea.sflag [#allocation3], %s832_s23 }
 0x159   : > { %p1037_p2 = pnand %p1043_p1, %p1256_p6 }
 0x15b   : > { %p1038_p3 = pneg %p1037_p2 }
 0x15d   : > { %1164 = dma.done.wait (%p1038_p3), %s833_s27, 16  }
 0x15e   : > { %1166 = vsyncadd (%p1038_p3), %s833_s27, 4294967280  ;;  %s841_s5 = scalar_lea.sflag [#allocation5], %s832_s23 }
 0x15f   : > { %1168 = dma.done.wait (%p1038_p3), %s841_s5, 16  }
 0x160   : > { %1170 = vsyncadd (%p1038_p3), %s841_s5, 4294967280  ;;  %p18_p5 = scmp.ge.s32.totalorder %s1239_s21, 4   ;;  %s1634_s15 = smov %s1177_s16 }
 0x161   : > { %s1635_s16 = smov %s1181_s17  ;;  %s1636_s17 = smov %s1250_s24 }
 0x162   : > { %s1637_s18 = smov %s1239_s21  ;;  %20 = sbr.rel (!%p18_p5) target bundleno = 5 (0x5), region = 92 }
 0x167   :  { %845 = vsyncpa [#allocation3], 1 }
 0x168   :  { %847 = vsyncpa [#allocation3 + $0x1], 1 }
 0x169   :  { %848 = vsyncpa [#allocation5], 1 }
 0x16a   :  { %850 = vsyncpa [#allocation5 + $0x1], 1 }

</bundles_post_ra>
